<compile_context>
chip_gen: v6e
topology: v6e:2x2x1
jax: 0.10.0
libtpu: 0.0.40
codegen_flags: <defaults>
</compile_context>

<pallas_src>
import functools

import jax
import jax.numpy as jnp
from jax.experimental import pallas as pl
from jax.experimental.pallas import tpu as pltpu


# ---------------------------------------------------------------------------
# Kernels
# ---------------------------------------------------------------------------

def _transform_kernel(x_ref, w_ref, z_ref):
    """Z[row_block] = X[row_block] @ W  (dense feature transform, hoisted)."""
    z_ref[...] = jnp.dot(
        x_ref[...], w_ref[...], preferred_element_type=jnp.float32
    ).astype(z_ref.dtype)


def _aggregate_kernel(a_ref, z_ref, b_ref, o_ref, acc_ref, *, apply_relu):
    """O[row_block] = act( sum_k A_hat[row_block, k_block] @ Z[k_block] + b )."""
    k = pl.program_id(1)

    @pl.when(k == 0)
    def _():
        acc_ref[...] = jnp.zeros_like(acc_ref)

    acc_ref[...] += jnp.dot(
        a_ref[...], z_ref[...], preferred_element_type=jnp.float32
    )

    @pl.when(k == pl.num_programs(1) - 1)
    def _():
        r = acc_ref[...] + b_ref[...]
        if apply_relu:
            r = jnp.maximum(r, 0.0)
        o_ref[...] = r.astype(o_ref.dtype)


# ---------------------------------------------------------------------------
# pallas_call wrappers
# ---------------------------------------------------------------------------

_VMEM_LIMIT = 48 * 1024 * 1024  # safe on v5e/v6e (128 MiB) and v7x (64 MiB)


def _round_up(v, m):
    return ((v + m - 1) // m) * m


def _pad2d(x, rows, cols):
    r, c = x.shape
    return jnp.pad(x, ((0, rows - r), (0, cols - c)))


def _transform(x, w, blk, out_dtype):
    n_p, f_p = x.shape
    h_p = w.shape[1]
    return pl.pallas_call(
        _transform_kernel,
        out_shape=jax.ShapeDtypeStruct((n_p, h_p), out_dtype),
        grid=(n_p // blk,),
        in_specs=[
            pl.BlockSpec((blk, f_p), lambda i: (i, 0)),   # X row block
            pl.BlockSpec((f_p, h_p), lambda i: (0, 0)),   # W (small, resident)
        ],
        out_specs=pl.BlockSpec((blk, h_p), lambda i: (i, 0)),
        compiler_params=pltpu.CompilerParams(
            dimension_semantics=("parallel",),
            vmem_limit_bytes=_VMEM_LIMIT,
        ),
    )(x, w)


def _aggregate(a, z, b, blk, apply_relu, out_dtype):
    n_p = a.shape[0]
    h_p = z.shape[1]
    kernel = functools.partial(_aggregate_kernel, apply_relu=apply_relu)
    return pl.pallas_call(
        kernel,
        out_shape=jax.ShapeDtypeStruct((n_p, h_p), out_dtype),
        grid=(n_p // blk, n_p // blk),
        in_specs=[
            pl.BlockSpec((blk, blk), lambda i, k: (i, k)),   # A_hat tile (bf16)
            pl.BlockSpec((blk, h_p), lambda i, k: (k, 0)),   # Z tile (bf16)
            pl.BlockSpec((1, h_p), lambda i, k: (0, 0)),     # bias row
        ],
        out_specs=pl.BlockSpec((blk, h_p), lambda i, k: (i, 0)),
        scratch_shapes=[pltpu.VMEM((blk, h_p), jnp.float32)],
        compiler_params=pltpu.CompilerParams(
            dimension_semantics=("parallel", "arbitrary"),
            vmem_limit_bytes=_VMEM_LIMIT,
        ),
    )(a, z, b)


def gcn_forward(a_hat, x, w1, b1, w2, b2, *, row_block_cap=512):
    """Two-layer GCN forward (eval mode: dropout layers are identity)."""
    n, feats = x.shape
    hidden = w1.shape[1]
    classes = w2.shape[1]

    # Lane/sublane-friendly padded dims (zero padding is exact for the math).
    f_p = _round_up(feats, 128)
    h_p = _round_up(hidden, 128)
    c_p = _round_up(classes, 128)
    blk = min(row_block_cap, _round_up(n, 128))   # <=512: fits v7x 64 MiB VMEM
    n_p = _round_up(n, blk)

    a_p = _pad2d(a_hat, n_p, n_p).astype(jnp.bfloat16)   # bf16 halves HBM traffic
    x_p = _pad2d(x, n_p, f_p).astype(jnp.float32)
    w1_p = _pad2d(w1, f_p, h_p).astype(jnp.float32)
    b1_p = _pad2d(b1.reshape(1, -1), 1, h_p).astype(jnp.float32)
    w2_p = _pad2d(w2, h_p, c_p).astype(jnp.float32)
    b2_p = _pad2d(b2.reshape(1, -1), 1, c_p).astype(jnp.float32)

    # Layer 1: h1 = relu(A_hat @ (X @ W1) + b1)
    z1 = _transform(x_p, w1_p, blk, jnp.bfloat16)
    h1 = _aggregate(a_p, z1, b1_p, blk, apply_relu=True, out_dtype=jnp.float32)

    # Layer 2: out = A_hat @ (h1 @ W2) + b2
    z2 = _transform(h1, w2_p, blk, jnp.bfloat16)
    out = _aggregate(a_p, z2, b2_p, blk, apply_relu=False, out_dtype=jnp.float32)

    return out[:n, :classes]


# ---------------------------------------------------------------------------
# Graph glue (plain JAX): symmetric normalization with self loops
# ---------------------------------------------------------------------------

def build_normalized_adjacency(edges, num_nodes):
    """edges: (2, E) int array of [src, dst]. Returns dense A_hat (N, N)."""
    a = jnp.zeros((num_nodes, num_nodes), jnp.float32)
    a = a.at[edges[0], edges[1]].set(1.0)
    a = a.at[edges[1], edges[0]].set(1.0)              # undirected
    idx = jnp.arange(num_nodes)
    a = a.at[idx, idx].set(1.0)                        # add_remaining_self_loops
    deg = a.sum(axis=1)
    dinv = jnp.where(deg > 0, jax.lax.rsqrt(deg), 0.0)
    return dinv[:, None] * a * dinv[None, :]


if __name__ == "__main__":
    key = jax.random.PRNGKey(0)
    k_x, k_e, k_w1, k_b1, k_w2, k_b2 = jax.random.split(key, 6)

    N, FEATS, HIDDEN, CLASSES, E = 32, 16, 32, 8, 64

    x = jax.random.normal(k_x, (N, FEATS), jnp.float32)
    edges = jax.random.randint(k_e, (2, E), 0, N, jnp.int32)
    a_hat = build_normalized_adjacency(edges, N)

    # Deterministic Glorot-style init (GCNConv: weight (in, out) + bias (out,))
    w1 = jax.random.normal(k_w1, (FEATS, HIDDEN), jnp.float32) / jnp.sqrt(FEATS)
    b1 = jax.random.normal(k_b1, (HIDDEN,), jnp.float32) * 0.01
    w2 = jax.random.normal(k_w2, (HIDDEN, CLASSES), jnp.float32) / jnp.sqrt(HIDDEN)
    b2 = jax.random.normal(k_b2, (CLASSES,), jnp.float32) * 0.01

    out = gcn_forward(a_hat, x, w1, b1, w2, b2)
    out = jax.block_until_ready(out)

    # Pure-f32 JAX reference; bf16 A_hat / Z tiles -> looser tolerance.
    ref = a_hat @ jnp.maximum(a_hat @ (x @ w1) + b1, 0.0) @ w2 + b2
    assert out.shape == (N, CLASSES)
    assert jnp.allclose(out, ref, atol=5e-2, rtol=5e-2), float(
        jnp.max(jnp.abs(out - ref))
    )
    print("KERNEL_OK")
</pallas_src>

<mosaic_0001>
module attributes {stable_mosaic.version = 11 : i64} {
  func.func @_transform_kernel(%arg0: i32, %arg1: memref<128x128xf32, #tpu.memory_space<vmem>>, %arg2: memref<128x128xf32, #tpu.memory_space<vmem>>, %arg3: memref<128x128xbf16, #tpu.memory_space<vmem>>) attributes {dimension_semantics = [#tpu.dimension_semantics<parallel>], iteration_bounds = array<i64: 1>, scalar_prefetch = 0 : i64, scratch_operands = 0 : i64, tpu.core_type = #tpu.core_type<tc>, window_params = [{transform_indices = @transform_0, window_bounds = array<i64: 128, 128>}, {pipeline_mode = #tpu.pipeline_mode<synchronous>, transform_indices = @transform_1, window_bounds = array<i64: 128, 128>}, {transform_indices = @transform_2, window_bounds = array<i64: 128, 128>}]} {
    %c0 = arith.constant 0 : index
    %c0_0 = arith.constant 0 : index
    %0 = vector.load %arg1[%c0, %c0_0] : memref<128x128xf32, #tpu.memory_space<vmem>>, vector<128x128xf32>
    %c0_1 = arith.constant 0 : index
    %c0_2 = arith.constant 0 : index
    %1 = vector.load %arg2[%c0_1, %c0_2] : memref<128x128xf32, #tpu.memory_space<vmem>>, vector<128x128xf32>
    %cst = arith.constant dense<0.000000e+00> : vector<128x128xf32>
    %2 = tpu.matmul %0, %1, %cst {dimension_numbers = #tpu.dot_dimension_numbers<[1], [0], [0], [1], [0, 0, 1, 1], [], []>} : vector<128x128xf32>, vector<128x128xf32>, vector<128x128xf32> -> vector<128x128xf32>
    %3 = arith.truncf %2 : vector<128x128xf32> to vector<128x128xbf16>
    %c0_3 = arith.constant 0 : index
    %c0_4 = arith.constant 0 : index
    %4 = vector.load %arg3[%c0_3, %c0_4] : memref<128x128xbf16, #tpu.memory_space<vmem>>, vector<128x128xbf16>
    tpu.vector_store %arg3[%c0_3, %c0_4], %3 {strides = array<i32>} : memref<128x128xbf16, #tpu.memory_space<vmem>>, vector<128x128xbf16>,
    return
  }
  func.func @transform_0(%arg0: i32) -> (i32, i32) {
    %c0_i32 = arith.constant 0 : i32
    %c0_i32_0 = arith.constant 0 : i32
    return %arg0, %c0_i32 : i32, i32
  }
  func.func @transform_1(%arg0: i32) -> (i32, i32) {
    %c0_i32 = arith.constant 0 : i32
    %c0_i32_0 = arith.constant 0 : i32
    %c0_i32_1 = arith.constant 0 : i32
    return %c0_i32, %c0_i32_0 : i32, i32
  }
  func.func @transform_2(%arg0: i32) -> (i32, i32) {
    %c0_i32 = arith.constant 0 : i32
    %c0_i32_0 = arith.constant 0 : i32
    return %arg0, %c0_i32 : i32, i32
  }
}

</mosaic_0001>

<bundles_post_ra>
// kernel: tpu_custom_call.1
= control target key start
LH: loop header
LB: loop body
LE: loop exit
PB: predicated region body
PF: predicated region fallthrough
CT: control target
= control target key end

     0   :  { %7 = vsyncpa [#allocation3], 0  ;;  %s618_s0 = inlined_call_operand.hbm [shape: f32[128,128], index: 0, kind: input, shape index: {}]   ;;  %s619_s1 = inlined_call_operand.hbm [shape: f32[128,128], index: 1, kind: input, shape index: {}]   ;;  %s620_s2 = inlined_call_operand.hbm [shape: bf16[128,128], index: 2, kind: output, shape index: {}]  }
   0x1   :  { %8 = vsyncpa [#allocation6], 0 }
   0x2   :  { %9 = vsyncpa [#allocation4], 0  ;;  %s587_s9 = smov [#allocation2]  }
   0x3   :  { %s15_s10 = sshll.u32 %s587_s9, 4  ;;  %s16_s10 = int_to_ptr.vmem [resolvable:$true] %s15_s10 }
   0x4   :  { %s529_s11 = scalar_lea.vmem %s16_s10, 2048  ;;  %p534_p1 = scmp.lt.s32.totalorder %s16_s10, %s16_s10 }
   0x5   :  { %p530_p0 = scmp.ne.s32.totalorder %s16_s10, %s529_s11  ;;  %p535_p2 = scmp.lt.s32.totalorder %s529_s11, %s529_s11 }
   0x7   :  { %p536_p3 = por %p535_p2, %p534_p1 }
   0x9   :  { %p537_p4 = pnand %p536_p3, %p530_p0 }
   0xb   :  { %540 = shalt.err (!%p537_p4)
}
   0xc   :  { %s588_s12 = smov 128   ;;  %s589_s13 = smov 8  }
   0xd   :  { %21 = dma.hbm_to_vmem [thread:$0]  %s618_s0, 2048, %s16_s10, [#allocation3], %s588_s12, %s588_s12, %s589_s13  }
   0xe   :  { %s590_s16 = smov [#allocation5]  }
   0xf   :  { %s27_s17 = sshll.u32 %s590_s16, 4  ;;  %s28_s17 = int_to_ptr.vmem [resolvable:$true] %s27_s17 }
  0x10   :  { %s549_s18 = scalar_lea.vmem %s28_s17, 2048  ;;  %p554_p6 = scmp.lt.s32.totalorder %s28_s17, %s28_s17 }
  0x11   :  { %p550_p5 = scmp.ne.s32.totalorder %s28_s17, %s549_s18  ;;  %p555_p7 = scmp.lt.s32.totalorder %s549_s18, %s549_s18 }
  0x13   :  { %p556_p8 = por %p555_p7, %p554_p6 }
  0x15   :  { %p557_p9 = pnand %p556_p8, %p550_p5 }
  0x17   :  { %560 = shalt.err (!%p557_p9)
}
  0x18   :  { %33 = dma.hbm_to_vmem [thread:$0]  %s619_s1, 2048, %s28_s17, [#allocation6], %s588_s12, %s588_s12, %s589_s13  }
  0x19   :  { %581 = dma.done.wait [#allocation3], 2048  }
  0x1a   :  { %582 = vsyncadd [#allocation3], 4294965248 }
  0x1b   :  { %583 = dma.done.wait [#allocation6], 2048  }
  0x1c   :  { %584 = vsyncadd [#allocation6], 4294965248  ;;  %v71_v0 = vld [vmem:[#allocation5 + $0x78] sm:$0xff]  ;;  %v70_v1 = vld [vmem:[#allocation5 + $0x70] sm:$0xff]  ;;  %s591_s0 = smov [#allocation7]  }
  0x1d   :  { %426 = vmatprep.subr.mxu0 %v71_v0  ;;  %482 = vmatprep.subr.mxu1 %v71_v0  ;;  %v69_v2 = vld [vmem:[#allocation5 + $0x68] sm:$0xff]  ;;  %v68_v3 = vld [vmem:[#allocation5 + $0x60] sm:$0xff]  ;;  %v67_v4 = vld [vmem:[#allocation5 + $0x58] sm:$0xff]  ;;  %s302_s1 = sshll.u32 %s591_s0, 4  ;;  %s303_s1 = int_to_ptr.vmem [resolvable:$true] %s302_s1 }
  0x1e   :  { %427 = vmatpush3.msra.mxu0 %v71_v0  ;;  %498 = vmatpush3.msra.mxu1 %v71_v0  ;;  %v66_v5 = vld [vmem:[#allocation5 + $0x50] sm:$0xff]  ;;  %v65_v6 = vld [vmem:[#allocation5 + $0x48] sm:$0xff]  ;;  %v64_v7 = vld [vmem:[#allocation5 + $0x40] sm:$0xff]  ;;  %s561_s21 = scalar_lea.vmem %s303_s1, 1024  ;;  %p566_p11 = scmp.lt.s32.totalorder %s303_s1, %s303_s1 }
  0x1f   :  { %428 = vmatprep.subr.mxu0 %v70_v1  ;;  %483 = vmatprep.subr.mxu1 %v70_v1  ;;  %v63_v8 = vld [vmem:[#allocation5 + $0x38] sm:$0xff]  ;;  %v62_v9 = vld [vmem:[#allocation5 + $0x30] sm:$0xff]  ;;  %v61_v10 = vld [vmem:[#allocation5 + $0x28] sm:$0xff]  ;;  %p562_p10 = scmp.ne.s32.totalorder %s303_s1, %s561_s21  ;;  %p567_p12 = scmp.lt.s32.totalorder %s561_s21, %s561_s21 }
  0x20   :  { %429 = vmatpush3.msra.mxu0 %v70_v1  ;;  %499 = vmatpush3.msra.mxu1 %v70_v1  ;;  %v60_v11 = vld [vmem:[#allocation5 + $0x20] sm:$0xff]  ;;  %v59_v12 = vld [vmem:[#allocation5 + $0x18] sm:$0xff]  ;;  %v58_v13 = vld [vmem:[#allocation5 + $0x10] sm:$0xff] }
  0x21   :  { %430 = vmatprep.subr.mxu0 %v69_v2  ;;  %484 = vmatprep.subr.mxu1 %v69_v2  ;;  %v57_v14 = vld [vmem:[#allocation5 + $0x8] sm:$0xff]  ;;  %v56_v15 = vld [vmem:[#allocation5] sm:$0xff]  ;;  %v42_v20 = vld [vmem:[#allocation2 + $0x10] sm:$0xff]  ;;  %p568_p13 = por %p567_p12, %p566_p11 }
  0x22   :  { %431 = vmatpush3.msra.mxu0 %v69_v2  ;;  %500 = vmatpush3.msra.mxu1 %v69_v2  ;;  %v40_v16 = vld [vmem:[#allocation2] sm:$0xff]  ;;  %v41_v18 = vld [vmem:[#allocation2 + $0x8] sm:$0xff]  ;;  %v50_v21 = vld [vmem:[#allocation2 + $0x50] sm:$0xff] }
  0x23   :  { %432 = vmatprep.subr.mxu0 %v68_v3  ;;  %485 = vmatprep.subr.mxu1 %v68_v3  ;;  %v48_v17 = vld [vmem:[#allocation2 + $0x40] sm:$0xff]  ;;  %v49_v19 = vld [vmem:[#allocation2 + $0x48] sm:$0xff]  ;;  %v43_v22 = vld [vmem:[#allocation2 + $0x18] sm:$0xff]  ;;  %p569_p0 = pnand %p568_p13, %p562_p10 }
  0x24   :  { %433 = vmatpush3.msra.mxu0 %v68_v3  ;;  %501 = vmatpush3.msra.mxu1 %v68_v3  ;;  %v51_v23 = vld [vmem:[#allocation2 + $0x58] sm:$0xff]  ;;  %v44_v24 = vld [vmem:[#allocation2 + $0x20] sm:$0xff]  ;;  %v45_v26 = vld [vmem:[#allocation2 + $0x28] sm:$0xff] }
  0x25   :  { %434 = vmatprep.subr.mxu0 %v67_v4  ;;  %486 = vmatprep.subr.mxu1 %v67_v4  ;;  %v52_v25 = vld [vmem:[#allocation2 + $0x60] sm:$0xff]  ;;  %v53_v27 = vld [vmem:[#allocation2 + $0x68] sm:$0xff]  ;;  %v46_v28 = vld [vmem:[#allocation2 + $0x30] sm:$0xff] }
  0x26   :  { %435 = vmatpush3.msra.mxu0 %v67_v4  ;;  %502 = vmatpush3.msra.mxu1 %v67_v4  ;;  %v54_v29 = vld [vmem:[#allocation2 + $0x70] sm:$0xff]  ;;  %v47_v30 = vld [vmem:[#allocation2 + $0x38] sm:$0xff] }
  0x27   :  { %436 = vmatprep.subr.mxu0 %v66_v5  ;;  %487 = vmatprep.subr.mxu1 %v66_v5  ;;  %v55_v31 = vld [vmem:[#allocation2 + $0x78] sm:$0xff] }
  0x28   :  { %437 = vmatpush3.msra.mxu0 %v66_v5  ;;  %503 = vmatpush3.msra.mxu1 %v66_v5 }
  0x29   :  { %438 = vmatprep.subr.mxu0 %v65_v6  ;;  %488 = vmatprep.subr.mxu1 %v65_v6 }
  0x2a   :  { %439 = vmatpush3.msra.mxu0 %v65_v6  ;;  %504 = vmatpush3.msra.mxu1 %v65_v6 }
  0x2b   :  { %440 = vmatprep.subr.mxu0 %v64_v7  ;;  %489 = vmatprep.subr.mxu1 %v64_v7 }
  0x2c   :  { %441 = vmatpush3.msra.mxu0 %v64_v7  ;;  %505 = vmatpush3.msra.mxu1 %v64_v7 }
  0x2d   :  { %442 = vmatprep.subr.mxu0 %v63_v8  ;;  %490 = vmatprep.subr.mxu1 %v63_v8 }
  0x2e   :  { %443 = vmatpush3.msra.mxu0 %v63_v8  ;;  %506 = vmatpush3.msra.mxu1 %v63_v8 }
  0x2f   :  { %444 = vmatprep.subr.mxu0 %v62_v9  ;;  %491 = vmatprep.subr.mxu1 %v62_v9 }
  0x30   :  { %445 = vmatpush3.msra.mxu0 %v62_v9  ;;  %507 = vmatpush3.msra.mxu1 %v62_v9 }
  0x31   :  { %446 = vmatprep.subr.mxu0 %v61_v10  ;;  %492 = vmatprep.subr.mxu1 %v61_v10 }
  0x32   :  { %447 = vmatpush3.msra.mxu0 %v61_v10  ;;  %508 = vmatpush3.msra.mxu1 %v61_v10 }
  0x33   :  { %448 = vmatprep.subr.mxu0 %v60_v11  ;;  %493 = vmatprep.subr.mxu1 %v60_v11 }
  0x34   :  { %449 = vmatpush3.msra.mxu0 %v60_v11  ;;  %509 = vmatpush3.msra.mxu1 %v60_v11 }
  0x35   :  { %450 = vmatprep.subr.mxu0 %v59_v12  ;;  %494 = vmatprep.subr.mxu1 %v59_v12 }
  0x36   :  { %451 = vmatpush3.msra.mxu0 %v59_v12  ;;  %510 = vmatpush3.msra.mxu1 %v59_v12 }
  0x37   :  { %452 = vmatprep.subr.mxu0 %v58_v13  ;;  %495 = vmatprep.subr.mxu1 %v58_v13 }
  0x38   :  { %453 = vmatpush3.msra.mxu0 %v58_v13  ;;  %511 = vmatpush3.msra.mxu1 %v58_v13 }
  0x39   :  { %454 = vmatprep.subr.mxu0 %v57_v14  ;;  %496 = vmatprep.subr.mxu1 %v57_v14 }
  0x3a   :  { %455 = vmatpush3.msra.mxu0 %v57_v14  ;;  %512 = vmatpush3.msra.mxu1 %v57_v14 }
  0x3b   :  { %456 = vmatprep.subr.mxu0 %v56_v15  ;;  %497 = vmatprep.subr.mxu1 %v56_v15 }
  0x3c   :  { %457 = vmatpush3.msra.mxu0 %v56_v15  ;;  %513 = vmatpush3.msra.mxu1 %v56_v15 }
  0x3d   :  { %458 = vmatprep.mubr.f32.mxu0 %v40_v16  ;;  %470 = vmatprep.mubr.f32.mxu1 %v48_v17 }
  0x3e   :  { %459 = vmatmul.mubr.f32.vlgmr.msra.gmra.mxu0 %v41_v18  ;;  %471 = vmatmul.mubr.f32.vlgmr.msra.gmra.mxu1 %v49_v19 }
  0x3f   :  { %461 = vmatprep.mubr.f32.mxu0 %v42_v20  ;;  %473 = vmatprep.mubr.f32.mxu1 %v50_v21 }
  0x42   :  { %462 = vmatmul.mubr.f32.gmra.mxu0 %v43_v22  ;;  %474 = vmatmul.mubr.f32.gmra.mxu1 %v51_v23 }
  0x43   :  { %464 = vmatprep.mubr.f32.mxu0 %v44_v24  ;;  %476 = vmatprep.mubr.f32.mxu1 %v52_v25 }
  0x46   :  { %465 = vmatmul.mubr.f32.gmra.mxu0 %v45_v26  ;;  %477 = vmatmul.mubr.f32.gmra.mxu1 %v53_v27 }
  0x47   :  { %467 = vmatprep.mubr.f32.mxu0 %v46_v28  ;;  %479 = vmatprep.mubr.f32.mxu1 %v54_v29 }
  0x4a   :  { %468 = vmatmul.mubr.f32.gmra.mxu0 %v47_v30  ;;  %480 = vmatmul.mubr.f32.gmra.mxu1 %v55_v31 }
  0xfe   :  { %v460_v32 = vpop.f32.mrf.mxu0  ;;  %v472_v33 = vpop.f32.mrf.mxu1 }
 0x100   :  { %v138_v34 = vpop.f32.mrf.mxu0  ;;  %v178_v35 = vpop.f32.mrf.mxu1 }
 0x101   :  { %v350_v36 = vpack.c.bf16 %v460_v32, %v138_v34  ;;  %v370_v37 = vpack.c.bf16 %v472_v33, %v178_v35 }
 0x102   :  { %v463_v38 = vpop.f32.mrf.mxu0  ;;  %v475_v39 = vpop.f32.mrf.mxu1 }
 0x103   :  { %351 = vst [vmem:[#allocation7] sm:$0xff] %v350_v36   ;;  %390 = vst [vmem:[#allocation7 + $0x20] sm:$0xff] %v370_v37  }
 0x104   :  { %v148_v40 = vpop.f32.mrf.mxu0  ;;  %v188_v41 = vpop.f32.mrf.mxu1 }
 0x105   :  { %v355_v42 = vpack.c.bf16 %v463_v38, %v148_v40  ;;  %v375_v43 = vpack.c.bf16 %v475_v39, %v188_v41 }
 0x106   :  { %v466_v44 = vpop.f32.mrf.mxu0  ;;  %v478_v45 = vpop.f32.mrf.mxu1 }
 0x107   :  { %387 = vst [vmem:[#allocation7 + $0x8] sm:$0xff] %v355_v42   ;;  %391 = vst [vmem:[#allocation7 + $0x28] sm:$0xff] %v375_v43  }
 0x108   :  { %v158_v46 = vpop.f32.mrf.mxu0  ;;  %v198_v47 = vpop.f32.mrf.mxu1 }
 0x109   :  { %v360_v48 = vpack.c.bf16 %v466_v44, %v158_v46  ;;  %v380_v49 = vpack.c.bf16 %v478_v45, %v198_v47 }
 0x10a   :  { %v469_v50 = vpop.f32.mrf.mxu0  ;;  %v481_v51 = vpop.f32.mrf.mxu1 }
 0x10b   :  { %388 = vst [vmem:[#allocation7 + $0x10] sm:$0xff] %v360_v48   ;;  %392 = vst [vmem:[#allocation7 + $0x30] sm:$0xff] %v380_v49  }
 0x10c   :  { %v168_v52 = vpop.f32.mrf.mxu0  ;;  %v208_v53 = vpop.f32.mrf.mxu1 }
 0x10d   :  { %v365_v54 = vpack.c.bf16 %v469_v50, %v168_v52  ;;  %v385_v55 = vpack.c.bf16 %v481_v51, %v208_v53 }
 0x10f   :  { %389 = vst [vmem:[#allocation7 + $0x18] sm:$0xff] %v365_v54   ;;  %393 = vst [vmem:[#allocation7 + $0x38] sm:$0xff] %v385_v55  }
 0x110   :  { %572 = shalt.err (!%p569_p0)
}
 0x111   :  { %s592_s22 = smov 64   ;;  %s593_s23 = smov 4  }
 0x112   :  { %308 = dma.vmem_to_hbm [thread:$0]  %s303_s1, 1024, %s620_s2, [#allocation4], %s592_s22, %s592_s22, %s593_s23  }
 0x113   :  { %585 = dma.done.wait [#allocation4], 1024  }
 0x114   :  { %586 = vsyncadd [#allocation4], 4294966272 }
 0x115   :  { %312 = vsyncpa [#allocation3], 1 }
 0x116   :  { %313 = vsyncpa [#allocation6], 1 }
 0x117   :  { %314 = vsyncpa [#allocation4], 1 }

</bundles_post_ra>
